<compile_context>
chip_gen: v5e
topology: v5e:2x2
jax: 0.10.0
libtpu: 0.0.40
codegen_flags: <defaults>
</compile_context>

<pallas_src>
import functools

import jax
import jax.numpy as jnp
from jax.experimental import pallas as pl
from jax.experimental.pallas import tpu as pltpu


# ----------------------------- Pallas kernel -------------------------------

def _conv1x1_kernel(w_ref, b_ref, x_ref, o_ref, *, cin, cout):
    """Pointwise channel mix on one (Nb, Cin, Ts, 128) tile.

    w_ref: SMEM (Cout, Cin) f32
    b_ref: SMEM (Cout,)     f32
    x_ref: VMEM (Nb, Cin,  Ts, 128)
    o_ref: VMEM (Nb, Cout, Ts, 128)
    """
    # Load each input channel plane once; reuse across all output channels.
    xs = [x_ref[:, ci].astype(jnp.float32) for ci in range(cin)]  # (Nb, Ts, 128)
    for co in range(cout):
        acc = xs[0] * w_ref[co, 0]
        for ci in range(1, cin):
            acc = acc + xs[ci] * w_ref[co, ci]
        o_ref[:, co] = (acc + b_ref[co]).astype(o_ref.dtype)


# ----------------------------- tiling planner -------------------------------

def _vmem_capacity_bytes():
    try:
        return int(pltpu.get_tpu_info().vmem_capacity_bytes)
    except Exception:
        return 64 << 20  # conservative fallback: v7x per-TensorCore VMEM


def _divisors(n):
    return [d for d in range(1, n + 1) if n % d == 0]


def _plan_tiles(n, cin, cout, hw, itemsize, budget):
    """Return (S_total, Ts, Nb).

    S_total: padded number of 128-lane sublane rows (HW padded to S_total*128)
    Ts:      sublane rows per block (== S_total, or a multiple of 8)
    Nb:      batch images per block
    """
    # Double-buffered bytes per sublane-row per image (input + output blocks).
    per_row = 2 * (cin + cout) * 128 * itemsize
    s_max = max(8, budget // per_row)

    s_needed = pl.cdiv(hw, 128)
    if s_needed <= s_max:
        s_total, ts = s_needed, s_needed            # whole spatial axis per step
    else:
        # Spatial axis must be tiled: pad so 8 | S_total, keeping the block's
        # second-to-last dim a multiple of 8 (the (8,128) constraint).
        s_total = ((s_needed + 7) // 8) * 8
        ts, d = 8, 8
        while d <= s_max:
            if s_total % d == 0:
                ts = d
            d += 8

    # Fold batch images into the block when the per-image slab is small.
    nb_cap = max(1, budget // (ts * per_row))
    nb = max(d for d in _divisors(n) if d <= nb_cap)

    # v7x has 2 TensorCores: keep >= 2 parallel grid steps when possible.
    if (n // nb) * (s_total // ts) < 2:
        if n > 1:
            nb = max(d for d in _divisors(n) if d < n)
        else:
            cands = [d for d in _divisors(s_total) if d < s_total and d % 8 == 0]
            if cands:
                ts = max(cands)
            # else: problem too small to split cleanly; single step is fine.
    return s_total, ts, nb


# --------------------------------- wrapper -----------------------------------

def out_conv(x_nchw, w, b):
    """OutConv.forward: nn.Conv2d(Cin, Cout, kernel_size=1)(x), NCHW in/out.

    x_nchw: (N, Cin, H, W)
    w:      (Cout, Cin) or torch-layout (Cout, Cin, 1, 1)
    b:      (Cout,)
    """
    if w.ndim == 4:
        w = w.reshape(w.shape[0], w.shape[1])
    N, Cin, H, W = x_nchw.shape
    Cout = w.shape[0]
    HW = H * W
    itemsize = x_nchw.dtype.itemsize

    # VMEM-aware limits: ~96 MiB scoped on v5e/v6e (128 MiB phys), ~48 MiB on
    # v7x (64 MiB phys); half of that is the block-planning budget (headroom
    # for pipeline scratch / semaphores).
    vmem_cap = _vmem_capacity_bytes()
    vmem_limit = min((vmem_cap * 3) // 4, 96 << 20)
    budget = vmem_limit // 2

    S_total, Ts, Nb = _plan_tiles(N, Cin, Cout, HW, itemsize, budget)
    HW_pad = S_total * 128

    x_flat = x_nchw.reshape(N, Cin, HW)        # contiguous reshape, no HBM transpose
    if HW_pad != HW:
        x_flat = jnp.pad(x_flat, ((0, 0), (0, 0), (0, HW_pad - HW)))
    x4 = x_flat.reshape(N, Cin, S_total, 128)  # spatial -> (sublane, lane), fully dense

    w32 = w.astype(jnp.float32)
    b32 = b.astype(jnp.float32)

    grid = (N // Nb, S_total // Ts)
    kernel = functools.partial(_conv1x1_kernel, cin=Cin, cout=Cout)

    cost = pl.CostEstimate(
        flops=2 * N * Cout * Cin * HW,
        transcendentals=0,
        bytes_accessed=N * (Cin + Cout) * HW * itemsize + (Cout * Cin + Cout) * 4,
    )

    out = pl.pallas_call(
        kernel,
        out_shape=jax.ShapeDtypeStruct((N, Cout, S_total, 128), x_nchw.dtype),
        grid=grid,
        in_specs=[
            pl.BlockSpec(memory_space=pltpu.MemorySpace.SMEM),            # w (tiny)
            pl.BlockSpec(memory_space=pltpu.MemorySpace.SMEM),            # b (tiny)
            pl.BlockSpec((Nb, Cin, Ts, 128), lambda n, s: (n, 0, s, 0)),  # x tile
        ],
        out_specs=pl.BlockSpec((Nb, Cout, Ts, 128), lambda n, s: (n, 0, s, 0)),
        compiler_params=pltpu.CompilerParams(
            dimension_semantics=("parallel", "parallel"),
            vmem_limit_bytes=vmem_limit,
        ),
        cost_estimate=cost,
    )(w32, b32, x4)

    out = out.reshape(N, Cout, HW_pad)
    if HW_pad != HW:
        out = out[:, :, :HW]
    return out.reshape(N, Cout, H, W)


# --------------------------- pure-JAX reference -----------------------------

def ref_out_conv(x_nchw, w, b):
    # Exact f32 elementwise reference for correctness checking.
    y = (x_nchw[:, None, :, :, :] * w[None, :, :, None, None]).sum(axis=2)
    return y + b[None, :, None, None]


# ---------------------------------- main ------------------------------------

if __name__ == "__main__":
    key = jax.random.PRNGKey(0)
    kx, kw, kb = jax.random.split(key, 3)

    N, Cin, Cout, H, W = 2, 4, 2, 16, 16          # OutConv(4, 2)
    x = jax.random.normal(kx, (N, Cin, H, W), jnp.float32)
    w = 0.1 * jax.random.normal(kw, (Cout, Cin), jnp.float32)
    b = 0.1 * jax.random.normal(kb, (Cout,), jnp.float32)

    out = jax.block_until_ready(out_conv(x, w, b))
    ref = jax.block_until_ready(ref_out_conv(x, w, b))

    assert out.shape == (N, Cout, H, W), out.shape
    assert jnp.allclose(out, ref, atol=1e-4, rtol=1e-4), float(jnp.max(jnp.abs(out - ref)))
    print("KERNEL_OK")
</pallas_src>

<mosaic_0001>
module attributes {stable_mosaic.version = 11 : i64} {
  func.func @_conv1x1_kernel(%arg0: i32, %arg1: i32, %arg2: memref<2x4xf32, #tpu.memory_space<smem>>, %arg3: memref<2xf32, #tpu.memory_space<smem>>, %arg4: memref<1x4x2x128xf32, #tpu.memory_space<vmem>>, %arg5: memref<1x2x2x128xf32, #tpu.memory_space<vmem>>) attributes {dimension_semantics = [#tpu.dimension_semantics<parallel>, #tpu.dimension_semantics<parallel>], iteration_bounds = array<i64: 2, 1>, scalar_prefetch = 0 : i64, scratch_operands = 0 : i64, tpu.core_type = #tpu.core_type<tc>, window_params = [{transform_indices = @transform_0, window_bounds = array<i64: 2, 4>}, {transform_indices = @transform_1, window_bounds = array<i64: 2>}, {transform_indices = @transform_2, window_bounds = array<i64: 1, 4, 2, 128>}, {transform_indices = @transform_3, window_bounds = array<i64: 1, 2, 2, 128>}]} {
    %c0 = arith.constant 0 : index
    %c0_0 = arith.constant 0 : index
    %c0_1 = arith.constant 0 : index
    %c0_2 = arith.constant 0 : index
    %0 = vector.load %arg4[%c0, %c0_0, %c0_1, %c0_2] : memref<1x4x2x128xf32, #tpu.memory_space<vmem>>, vector<1x1x2x128xf32>
    %1 = vector.shape_cast %0 : vector<1x1x2x128xf32> to vector<1x2x128xf32>
    %c0_3 = arith.constant 0 : index
    %c1 = arith.constant 1 : index
    %c0_4 = arith.constant 0 : index
    %c0_5 = arith.constant 0 : index
    %2 = vector.load %arg4[%c0_3, %c1, %c0_4, %c0_5] : memref<1x4x2x128xf32, #tpu.memory_space<vmem>>, vector<1x1x2x128xf32>
    %3 = vector.shape_cast %2 : vector<1x1x2x128xf32> to vector<1x2x128xf32>
    %c0_6 = arith.constant 0 : index
    %c2 = arith.constant 2 : index
    %c0_7 = arith.constant 0 : index
    %c0_8 = arith.constant 0 : index
    %4 = vector.load %arg4[%c0_6, %c2, %c0_7, %c0_8] : memref<1x4x2x128xf32, #tpu.memory_space<vmem>>, vector<1x1x2x128xf32>
    %5 = vector.shape_cast %4 : vector<1x1x2x128xf32> to vector<1x2x128xf32>
    %c0_9 = arith.constant 0 : index
    %c3 = arith.constant 3 : index
    %c0_10 = arith.constant 0 : index
    %c0_11 = arith.constant 0 : index
    %6 = vector.load %arg4[%c0_9, %c3, %c0_10, %c0_11] : memref<1x4x2x128xf32, #tpu.memory_space<vmem>>, vector<1x1x2x128xf32>
    %7 = vector.shape_cast %6 : vector<1x1x2x128xf32> to vector<1x2x128xf32>
    %c0_12 = arith.constant 0 : index
    %c0_13 = arith.constant 0 : index
    %8 = memref.load %arg2[%c0_12, %c0_13] : memref<2x4xf32, #tpu.memory_space<smem>>
    %9 = vector.broadcast %8 : f32 to vector<1x2x128xf32>
    %10 = arith.mulf %1, %9 : vector<1x2x128xf32>
    %c0_14 = arith.constant 0 : index
    %c1_15 = arith.constant 1 : index
    %11 = memref.load %arg2[%c0_14, %c1_15] : memref<2x4xf32, #tpu.memory_space<smem>>
    %12 = vector.broadcast %11 : f32 to vector<1x2x128xf32>
    %13 = arith.mulf %3, %12 : vector<1x2x128xf32>
    %14 = arith.addf %10, %13 : vector<1x2x128xf32>
    %c0_16 = arith.constant 0 : index
    %c2_17 = arith.constant 2 : index
    %15 = memref.load %arg2[%c0_16, %c2_17] : memref<2x4xf32, #tpu.memory_space<smem>>
    %16 = vector.broadcast %15 : f32 to vector<1x2x128xf32>
    %17 = arith.mulf %5, %16 : vector<1x2x128xf32>
    %18 = arith.addf %14, %17 : vector<1x2x128xf32>
    %c0_18 = arith.constant 0 : index
    %c3_19 = arith.constant 3 : index
    %19 = memref.load %arg2[%c0_18, %c3_19] : memref<2x4xf32, #tpu.memory_space<smem>>
    %20 = vector.broadcast %19 : f32 to vector<1x2x128xf32>
    %21 = arith.mulf %7, %20 : vector<1x2x128xf32>
    %22 = arith.addf %18, %21 : vector<1x2x128xf32>
    %c0_20 = arith.constant 0 : index
    %23 = memref.load %arg3[%c0_20] : memref<2xf32, #tpu.memory_space<smem>>
    %24 = vector.broadcast %23 : f32 to vector<1x2x128xf32>
    %25 = arith.addf %22, %24 : vector<1x2x128xf32>
    %c0_21 = arith.constant 0 : index
    %c0_22 = arith.constant 0 : index
    %c0_23 = arith.constant 0 : index
    %c0_24 = arith.constant 0 : index
    %26 = vector.load %arg5[%c0_21, %c0_22, %c0_23, %c0_24] : memref<1x2x2x128xf32, #tpu.memory_space<vmem>>, vector<1x1x2x128xf32>
    %27 = vector.shape_cast %26 : vector<1x1x2x128xf32> to vector<1x2x128xf32>
    %28 = vector.shape_cast %25 : vector<1x2x128xf32> to vector<1x1x2x128xf32>
    tpu.vector_store %arg5[%c0_21, %c0_22, %c0_23, %c0_24], %28 {strides = array<i32>} : memref<1x2x2x128xf32, #tpu.memory_space<vmem>>, vector<1x1x2x128xf32>,
    %c1_25 = arith.constant 1 : index
    %c0_26 = arith.constant 0 : index
    %29 = memref.load %arg2[%c1_25, %c0_26] : memref<2x4xf32, #tpu.memory_space<smem>>
    %30 = vector.broadcast %29 : f32 to vector<1x2x128xf32>
    %31 = arith.mulf %1, %30 : vector<1x2x128xf32>
    %c1_27 = arith.constant 1 : index
    %c1_28 = arith.constant 1 : index
    %32 = memref.load %arg2[%c1_27, %c1_28] : memref<2x4xf32, #tpu.memory_space<smem>>
    %33 = vector.broadcast %32 : f32 to vector<1x2x128xf32>
    %34 = arith.mulf %3, %33 : vector<1x2x128xf32>
    %35 = arith.addf %31, %34 : vector<1x2x128xf32>
    %c1_29 = arith.constant 1 : index
    %c2_30 = arith.constant 2 : index
    %36 = memref.load %arg2[%c1_29, %c2_30] : memref<2x4xf32, #tpu.memory_space<smem>>
    %37 = vector.broadcast %36 : f32 to vector<1x2x128xf32>
    %38 = arith.mulf %5, %37 : vector<1x2x128xf32>
    %39 = arith.addf %35, %38 : vector<1x2x128xf32>
    %c1_31 = arith.constant 1 : index
    %c3_32 = arith.constant 3 : index
    %40 = memref.load %arg2[%c1_31, %c3_32] : memref<2x4xf32, #tpu.memory_space<smem>>
    %41 = vector.broadcast %40 : f32 to vector<1x2x128xf32>
    %42 = arith.mulf %7, %41 : vector<1x2x128xf32>
    %43 = arith.addf %39, %42 : vector<1x2x128xf32>
    %c1_33 = arith.constant 1 : index
    %44 = memref.load %arg3[%c1_33] : memref<2xf32, #tpu.memory_space<smem>>
    %45 = vector.broadcast %44 : f32 to vector<1x2x128xf32>
    %46 = arith.addf %43, %45 : vector<1x2x128xf32>
    %c0_34 = arith.constant 0 : index
    %c1_35 = arith.constant 1 : index
    %c0_36 = arith.constant 0 : index
    %c0_37 = arith.constant 0 : index
    %47 = vector.load %arg5[%c0_34, %c1_35, %c0_36, %c0_37] : memref<1x2x2x128xf32, #tpu.memory_space<vmem>>, vector<1x1x2x128xf32>
    %48 = vector.shape_cast %47 : vector<1x1x2x128xf32> to vector<1x2x128xf32>
    %49 = vector.shape_cast %46 : vector<1x2x128xf32> to vector<1x1x2x128xf32>
    tpu.vector_store %arg5[%c0_34, %c1_35, %c0_36, %c0_37], %49 {strides = array<i32>} : memref<1x2x2x128xf32, #tpu.memory_space<vmem>>, vector<1x1x2x128xf32>,
    return
  }
  func.func @transform_0(%arg0: i32, %arg1: i32) -> (i32, i32) {
    %c0_i32 = arith.constant 0 : i32
    %c0_i32_0 = arith.constant 0 : i32
    %c0_i32_1 = arith.constant 0 : i32
    return %c0_i32, %c0_i32_0 : i32, i32
  }
  func.func @transform_1(%arg0: i32, %arg1: i32) -> i32 {
    %c0_i32 = arith.constant 0 : i32
    %c0_i32_0 = arith.constant 0 : i32
    return %c0_i32 : i32
  }
  func.func @transform_2(%arg0: i32, %arg1: i32) -> (i32, i32, i32, i32) {
    %c0_i32 = arith.constant 0 : i32
    %c0_i32_0 = arith.constant 0 : i32
    %c0_i32_1 = arith.constant 0 : i32
    return %arg0, %c0_i32, %arg1, %c0_i32_0 : i32, i32, i32, i32
  }
  func.func @transform_3(%arg0: i32, %arg1: i32) -> (i32, i32, i32, i32) {
    %c0_i32 = arith.constant 0 : i32
    %c0_i32_0 = arith.constant 0 : i32
    %c0_i32_1 = arith.constant 0 : i32
    return %arg0, %c0_i32, %arg1, %c0_i32_0 : i32, i32, i32, i32
  }
}

</mosaic_0001>

<bundles_post_ra>
// kernel: tpu_custom_call.1
= control target key start
LH: loop header
LB: loop body
LE: loop exit
PB: predicated region body
PF: predicated region fallthrough
CT: control target
= control target key end

     0   :  { %s865_s0 = inlined_call_operand.hbm [shape: f32[2,4], index: 0, kind: input, shape index: {}]   ;;  %s866_s1 = inlined_call_operand.hbm [shape: f32[2], index: 1, kind: input, shape index: {}]   ;;  %s867_s2 = inlined_call_operand.hbm [shape: f32[2,4,2,128], index: 2, kind: input, shape index: {}]   ;;  %s868_s3 = inlined_call_operand.hbm [shape: f32[2,2,2,128], index: 3, kind: output, shape index: {}]  }
   0x1   :  { %869 = sst [smem:[#allocation14_spill]] %s865_s0 }
   0x2   :  { %8 = vsyncpa [#allocation5], 0 }
   0x3   :  { %9 = vsyncpa [#allocation7], 0 }
   0x4   :  { %10 = vsyncpa [#allocation3], 0 }
   0x5   :  { %12 = vsyncpa [#allocation3 + $0x1], 0 }
   0x6   :  { %13 = vsyncpa [#allocation4], 0 }
   0x7   :  { %15 = vsyncpa [#allocation4 + $0x1], 0  ;;  %s703_s12 = smov 0   ;;  %s705_s13 = smov 0  }
   0x8   :  { %s707_s14 = smov 0   ;;  %s709_s15 = smov 0  }
   0x9   :  { %s711_s16 = smov 0   ;;  %s713_s17 = smov 0  }
   0xa LB: > { %s405_s18 = sadd.s32 4294967295, %s675_s17   ;;  %s406_s19 = sadd.s32 4294967294, %s675_s17   ;;  %s675_s17 = sphi %s713_s17, %s21_s17   ;;  %s671_s16 = sphi %s711_s16, %s882_s16   ;;  %s667_s15 = sphi %s709_s15, %s881_s15   ;;  %s663_s14 = sphi %s707_s14, %s880_s14   ;;  %s659_s13 = sphi %s705_s13, %s879_s13   ;;  %s655_s12 = sphi %s703_s12, %s878_s12  }
   0xb   : > { %s84_s20 = sadd.s32 1, %s663_s14  ;;  %p91_p0 = scmp.ne.s32.totalorder %s663_s14, %s659_s13 }
   0xc   : > { %p92_p1 = scmp.eq.s32.totalorder %s675_s17, 0  ;;  %p97_p2 = scmp.ne.s32.totalorder %s659_s13, %s655_s12 }
   0xd   : > { %p741_p3 = scmp.eq.s32.totalorder %s405_s18, 0  ;;  %p123_p4 = scmp.eq.s32.totalorder %s405_s18, 1 }
   0xe   : > { %p745_p5 = por %p92_p1, %p91_p0  ;;  %p129_p6 = scmp.eq.s32.totalorder %s406_s19, 1 }
   0xf   : > { %p751_p7 = por %p741_p3, %p97_p2  ;;  %p755_p8 = por %p123_p4, %p91_p0 }
  0x10   : > { %p759_p9 = por %p129_p6, %p97_p2  ;;  %p407_p10 = scmp.ge.s32.totalorder %s675_s17, 1 }
  0x11   : > { %p136_p11 = scmp.lt.s32.totalorder %s675_s17, 3  ;;  %s875_s0 = sld [smem:[#allocation14_spill]] }
  0x12   : > { %p410_p13 = scmp.ge.s32.totalorder %s675_s17, 2  ;;  %p467_p0 = scmp.lt.s32.totalorder %s675_s17, 2 }
  0x13   : > { %p768_p12 = pnand %p407_p10, %p136_p11  ;;  %s158_s5 = sshll.u32 %s866_s1, 4  ;;  %s159_s5 = int_to_ptr.hbm [resolvable:$true] %s158_s5 }
  0x14   : > { %p781_p2 = pnand %p467_p0, %p745_p5  ;;  %s677_s7 = smov [#allocation2]  }
  0x15   : > { %p450_p1 = pneg %p768_p12  ;;  %s678_s8 = smov [#allocation6]  }
  0x16   : > { %s33_s9 = sadd.s32 1, %s671_s16  ;;  %s169_s10 = sand.u32 1, %s663_s14  }
  0x17   : > { %s148_s28 = sshll.u32 %s875_s0, 4  ;;  %p451_p4 = pnand %p450_p1, %p741_p3  ;;  %s149_s28 = int_to_ptr.hbm [resolvable:$true] %s148_s28 }
  0x18   : > { %p35_p6 = scmp.ge.s32.totalorder %s33_s9, 2  ;;  %s411_s11 = sshll.u32 %s169_s10, 3 }
  0x19   : > { %453 = dma.hbm_to_smem (!%p451_p4), %s149_s28, 32, %s677_s7, [#allocation5]  }
  0x1a   : > { %456 = dma.hbm_to_smem (!%p451_p4), %s159_s5, 16, %s678_s8, [#allocation7]  }
  0x1b   : > { %s436_s18 = sshll.u32 %s671_s16, 3  ;;  %s884_s9 = smov (%p35_p6, %s33_s9), 0 }
  0x1c   : > { %s179_s26 = scalar_lea.hbm %s867_s2, %s436_s18  ;;  %s79_s27 = ssub.s32 %s671_s16, %s884_s9 }
  0x1d   : > { %s180_s30 = sshll.u32 %s179_s26, 4  ;;  %p82_p5 = scmp.eq.s32.totalorder %s79_s27, 0  ;;  %s181_s30 = int_to_ptr.hbm [resolvable:$true] %s180_s30 }
  0x1e   : > { %s173_s28 = scalar_lea.vmem [#allocation8], %s411_s11  ;;  %s170_s7 = scalar_lea.sflag [#allocation3], %s169_s10 }
  0x1f   : > { %s182_s4 = sshll.u32 %s173_s28, 4  ;;  %s679_s8 = smov 32   ;;  %s183_s4 = int_to_ptr.vmem [resolvable:$true] %s182_s4 }
  0x20   : > { %s800_s5 = scalar_select %p82_p5, %s663_s14, %s84_s20  }
  0x21   : > { %s680_s0 = smov 2   ;;  %194 = sbr.rel (%p768_p12) target bundleno = 74 (0x4a), region = 32 }
  0x22   : > { %460 = dma.hbm_to_vmem [thread:$0]  (!%p781_p2), %s181_s30, 128, %s183_s4, %s170_s7, %s679_s8, %s679_s8, %s680_s0  }
  0x26   : > { %638 = dma.done.wait (%p741_p3), [#allocation5], 32  }
  0x27   : > { %640 = vsyncadd (%p741_p3), [#allocation5], 4294967264 }
  0x28   : > { %642 = dma.done.wait (%p741_p3), [#allocation7], 16  }
  0x29   : > { %644 = vsyncadd (%p741_p3), [#allocation7], 4294967280  ;;  %s815_s20 = sand.u32 1, %s659_s13  }
  0x2a   : > { %s417_s0 = sshll.u32 %s815_s20, 3  ;;  %s207_s29 = scalar_lea.sflag [#allocation3], %s815_s20 }
  0x2b   : > { %s210_s6 = scalar_lea.vmem [#allocation8], %s417_s0 }
  0x2c   : > { %646 = dma.done.wait (%p751_p7), %s207_s29, 128  }
  0x2d   : > { %648 = vsyncadd (%p751_p7), %s207_s29, 4294967168 }
  0x2e   : > { %216 = sfence }
  0x2f   : > { %s242_s10 = sld [smem:[#allocation2]]  ;;  %v235_v0 = vld [vmem:[%s210_s6] sm:$0x3]  ;;  %v419_v1 = vld [vmem:[%s210_s6 + $0x2] sm:$0x3]  ;;  %s418_s28 = sshll.u32 %s815_s20, 2 }
  0x30   : > { %s422_s11 = sld [smem:[#allocation2 + $0x1]]  ;;  %v420_v2 = vld [vmem:[%s210_s6 + $0x4] sm:$0x3]  ;;  %v421_v4 = vld [vmem:[%s210_s6 + $0x6] sm:$0x3]  ;;  %s437_s4 = sshll.u32 %s667_s15, 2 }
  0x31   : > { %s423_s18 = sld [smem:[#allocation2 + $0x2]]  ;;  %s294_s0 = scalar_lea.hbm %s868_s3, %s437_s4 }
  0x32   : > { %s424_s21 = sld [smem:[#allocation2 + $0x3]]  ;;  %s234_s29 = scalar_lea.vmem [#allocation9], %s418_s28 }
  0x33   : > { %s823_s19 = sld [smem:[#allocation6]]  ;;  %s295_s15 = sshll.u32 %s234_s29, 4  ;;  %s296_s15 = int_to_ptr.vmem [resolvable:$true] %s295_s15 }
  0x34   : > { %s425_s22 = sld [smem:[#allocation2 + $0x80]]  ;;  %s297_s6 = sshll.u32 %s294_s0, 4  ;;  %s298_s6 = int_to_ptr.hbm [resolvable:$true] %s297_s6 }
  0x35   : > { %v243_v3 = vstv %s242_s10  ;;  %s426_s26 = sld [smem:[#allocation2 + $0x81]]  ;;  %s282_s10 = scalar_lea.sflag [#allocation4], %s815_s20 }
  0x36   : > { %v244_v5 = vmul.f32 %v243_v3, %v235_v0  ;;  %v246_v6 = vstv %s422_s11  ;;  %s427_s23 = sld [smem:[#allocation2 + $0x82]]  ;;  %s599_s11 = sshra.s32 %s298_s6, 4  ;;  %s600_s11 = int_to_ptr.hbm [resolvable:$true] %s599_s11 }
  0x37   : > { %v247_v7 = vmul.f32 %v419_v1, %v246_v6  ;;  %v250_v8 = vstv %s423_s18  ;;  %s428_s27 = sld [smem:[#allocation2 + $0x83]]  ;;  %s601_s18 = scalar_lea.hbm %s600_s11, 4 }
  0x38   : > { %v251_v9 = vmul.f32 %v420_v2, %v250_v8  ;;  %v254_v10 = vstv %s424_s21  ;;  %s429_s30 = sld [smem:[#allocation6 + $0x1]]  ;;  %p602_p3 = scmp.ne.s32.totalorder %s600_s11, %s601_s18 }
  0x39   : > { %v248_v11 = vadd.f32 %v247_v7, %v244_v5  ;;  %v255_v12 = vmul.f32 %v421_v4, %v254_v10  ;;  %v258_v17 = vstv %s823_s19  ;;  %p606_p11 = scmp.lt.s32.totalorder %s600_s11, %s868_s3 }
  0x3a   : > { %v262_v13 = vstv %s425_s22  ;;  %p603_p7 = pnand %p602_p3, %p755_p8  ;;  %s605_s22 = scalar_lea.hbm %s868_s3, 8 }
  0x3b   : > { %v252_v14 = vadd.f32 %v251_v9, %v248_v11  ;;  %v263_v15 = vmul.f32 %v262_v13, %v235_v0  ;;  %v265_v16 = vstv %s426_s26  ;;  %p607_p12 = scmp.lt.s32.totalorder %s605_s22, %s601_s18 }
  0x3c   : > { %v266_v18 = vmul.f32 %v419_v1, %v265_v16  ;;  %v269_v19 = vstv %s427_s23  ;;  %p604_p10 = pneg %p603_p7 }
  0x3d   : > { %v256_v20 = vadd.f32 %v255_v12, %v252_v14  ;;  %v270_v21 = vmul.f32 %v420_v2, %v269_v19  ;;  %v273_v22 = vstv %s428_s27  ;;  %p608_p0 = por %p607_p12, %p606_p11 }
  0x3e   : > { %v267_v23 = vadd.f32 %v266_v18, %v263_v15  ;;  %v274_v24 = vmul.f32 %v421_v4, %v273_v22  ;;  %v277_v27 = vstv %s429_s30 }
  0x3f   : > { %v259_v25 = vadd.f32 %v258_v17, %v256_v20  ;;  %p609_p1 = pnand %p608_p0, %p604_p10 }
  0x40   : > { %v271_v26 = vadd.f32 %v270_v21, %v267_v23 }
  0x41   : > { %260 = vst [vmem:[%s234_s29] sm:$0x3] %v259_v25 }
  0x42   : > { %v275_v28 = vadd.f32 %v274_v24, %v271_v26 }
  0x44   : > { %v278_v29 = vadd.f32 %v277_v27, %v275_v28 }
  0x46   : > { %430 = vst [vmem:[%s234_s29 + $0x2] sm:$0x3] %v278_v29 }
  0x47   : > { %612 = shalt.err (!%p609_p1)
}
  0x48   : > { %s681_s20 = smov 32   ;;  %s682_s27 = smov 2  }
  0x49   : > { %448 = dma.vmem_to_hbm [thread:$0]  (%p755_p8), %s296_s15, 64, %s298_s6, %s282_s10, %s681_s20, %s681_s20, %s682_s27  }
  0x4a PF: > { %s312_s30 = sand.u32 1, %s655_s12   ;;  %p462_p2 = pnand %p410_p13, %p759_p9 }
  0x4b   : > { %s313_s28 = scalar_lea.sflag [#allocation4], %s312_s30 }
  0x4c   : > { %p463_p4 = pneg %p462_p2 }
  0x4e   : > { %650 = dma.done.wait (%p463_p4), %s313_s28, 64  }
  0x4f   : > { %652 = vsyncadd (%p463_p4), %s313_s28, 4294967232  ;;  %s21_s17 = sadd.s32 1, %s675_s17   ;;  %s878_s12 = smov %s659_s13 }
  0x50   : > { %p18_p6 = scmp.ge.s32.totalorder %s21_s17, 4   ;;  %s879_s13 = smov %s663_s14 }
  0x51   : > { %s880_s14 = smov %s800_s5  ;;  %s881_s15 = smov %s671_s16 }
  0x52   : > { %s882_s16 = smov %s884_s9  ;;  %20 = sbr.rel (!%p18_p6) target bundleno = 10 (0xa), region = 90 }
  0x57   :  { %319 = vsyncpa [#allocation3], 1 }
  0x58   :  { %321 = vsyncpa [#allocation3 + $0x1], 1 }
  0x59   :  { %322 = vsyncpa [#allocation4], 1 }
  0x5a   :  { %324 = vsyncpa [#allocation4 + $0x1], 1 }
  0x5b   :  { %325 = vsyncpa [#allocation5], 1 }
  0x5c   :  { %327 = vsyncpa [#allocation5 + $0x1], 1 }
  0x5d   :  { %328 = vsyncpa [#allocation7], 1 }

</bundles_post_ra>
